<compile_context>
chip_gen: v6e
topology: v6e:2x2x1
jax: 0.10.0
libtpu: 0.0.40
codegen_flags: <defaults>
</compile_context>

<pallas_src>
import functools

import jax
import jax.numpy as jnp
import numpy as np
from jax.experimental import pallas as pl
from jax.experimental.pallas import tpu as pltpu


def _random_filter_kernel(w_ref, x_ref, o_ref, *, k, H, W, Rb, Bt, fix_nan):
    """Per-sample random filtering on lane-folded (Rb, 128) slabs.

    w_ref: (B*k*k,) float32 in SMEM (scalar-prefetched taps, flattened 1-D).
    x_ref: (Bt, Rb, 128) VMEM -- whole channels of Bt consecutive samples,
           flattened row-major (c, h, w) -> f = c*H*W + h*W + w and folded as
           (f // 128, f % 128).
    o_ref: (Bt, Rb, 128) VMEM.
    """
    pad = k // 2
    G = 128 // W                       # image rows per 128-lane group
    log2w = W.bit_length() - 1
    base = pl.program_id(0) * Bt       # first sample handled by this grid step

    # ---- tap-independent constants, hoisted out of every loop ---------------
    # Banded masks for the (128, 128) lane-mixing matrices: entry (i, j)
    # belongs to horizontal tap dx iff i - j == dx AND i, j are in the same
    # W-aligned lane group (same image row), which bakes the horizontal
    # zero-padding directly into the matrix (no per-tap wmask on the big slab).
    ii = jax.lax.broadcasted_iota(jnp.int32, (128, 128), 0)   # input lane
    jj = jax.lax.broadcasted_iota(jnp.int32, (128, 128), 1)   # output lane
    same_row = (ii >> log2w) == (jj >> log2w)
    band = [(same_row & ((ii - jj) == (ix - pad))).astype(jnp.float32)
            for ix in range(k)]

    # Vertical-padding masks (one per dy != 0) and cross-row blend masks (one
    # per dy whose flattened shift is not 128-aligned), computed once on the
    # (Rb, 128) slab; the int32 iotas are dead after this prologue.
    ri = jax.lax.broadcasted_iota(jnp.int32, (Rb, 128), 0)
    ln = jax.lax.broadcasted_iota(jnp.int32, (Rb, 128), 1)
    h_idx = (ri * G + (ln >> log2w)) & (H - 1)     # image row of each element
    shift_qr, hmask, blend = {}, {}, {}
    for iy in range(k):
        dy = iy - pad
        q, r = divmod(dy * W, 128)                 # flattened shift = q*128 + r
        shift_qr[dy] = (q, r)
        if r != 0:
            blend[dy] = ln < (128 - r)
        if dy > 0:
            hmask[dy] = h_idx < (H - dy)
        elif dy < 0:
            hmask[dy] = h_idx >= (-dy)

    for bi in range(Bt):                           # static unroll (packed samples)
        b = base + bi
        x = x_ref[bi].astype(jnp.float32)          # (Rb, 128); cast hoisted

        def row_roll(qv):
            amt = (-qv) % Rb
            return x if amt == 0 else pltpu.roll(x, shift=amt, axis=0)

        acc = jnp.zeros_like(x)
        for iy in range(k):
            dy = iy - pad
            q, r = shift_qr[dy]

            # Whole-slab shift by dy*W: one (row-roll, lane-roll, select)
            # reconstruction per dy (v2 did this per tap).  Wrapped /
            # cross-channel lanes are always discarded by hmask below.
            if r == 0:
                shifted = row_roll(q)
            else:
                lane_shift = 128 - r
                cand_a = pltpu.roll(row_roll(q), shift=lane_shift, axis=1)
                cand_b = pltpu.roll(row_roll(q + 1), shift=lane_shift, axis=1)
                shifted = jnp.where(blend[dy], cand_a, cand_b)

            # Banded shift-and-scale matrix from this sample's row-dy taps
            # (scalar SMEM reads broadcast onto tiny (128, 128) masks).
            d_mat = band[0] * w_ref[b * (k * k) + iy * k]
            for ix in range(1, k):
                d_mat = d_mat + band[ix] * w_ref[b * (k * k) + iy * k + ix]

            # All horizontal taps of this dy in one small MXU matmul.
            row_acc = jnp.dot(shifted, d_mat, preferred_element_type=jnp.float32)

            if dy == 0:
                acc = acc + row_acc
            else:
                acc = acc + jnp.where(hmask[dy], row_acc, 0.0)

        if fix_nan:   # torch parity: filtered_img[filtered_img.isnan()] = 1.0
            acc = jnp.where(jnp.isnan(acc), jnp.float32(1.0), acc)
        o_ref[bi] = jnp.clip(acc, 0.0, 1.0).astype(o_ref.dtype)


def _vmem_capacity_bytes():
    """Physical VMEM of the attached TPU; conservative fallback if unknown."""
    try:
        return int(pltpu.get_tpu_info().vmem_capacity_bytes)
    except Exception:
        return 64 << 20        # assume the smaller v7x-class VMEM if unsure


def random_filter_forward(img, conv_weight, kernel_size, *, fix_nan=True):
    """img: (B, C, H, W); conv_weight: (B, k, k).  Matches RandomFilter.forward."""
    B, C, H, W = img.shape
    k = kernel_size
    assert conv_weight.shape == (B, k, k)
    assert k % 2 == 1 and k <= H and k <= W
    # Lane-folded fast-path requirements (cover the usual square power-of-two
    # crops, including this test).
    # TODO(synk): general H/W (e.g. 224) needs a div-free h-index path
    # (host-precomputed per-row phases) since Mosaic has no vector int div/mod.
    assert W & (W - 1) == 0 and W <= 128, "W must be a power of two <= 128"
    assert H & (H - 1) == 0, "H must be a power of two"
    assert (C * H * W) % 128 == 0, "per-sample element count must be 128-divisible"

    itemsize = img.dtype.itemsize
    R_total = (C * H * W) // 128
    # Contiguous-dim reshapes only -> no extra HBM traffic, no padded copy.
    x_fold = img.reshape(B, R_total, 128)
    # Taps flattened to 1-D: 1-D SMEM pads to next_pow2(4N) bytes instead of
    # the much larger 2-D [ceil(B/8)*8, 128]-word padding.
    w_flat = conv_weight.reshape(B * k * k).astype(jnp.float32)

    # ---- generation-aware block budget --------------------------------------
    vmem_cap = _vmem_capacity_bytes()
    is_small_vmem = vmem_cap <= (64 << 20)          # v7x-class VMEM
    block_budget = (1 << 20) if is_small_vmem else (4 << 20)

    # ---- channel tiling: whole channels per block (no halo needed) ----------
    Rb = R_total
    if (H * W) % 128 == 0:
        rpc = (H * W) // 128                        # rows per channel
        budget_rows = block_budget // (128 * itemsize)
        legal = sorted({rpc * tc for tc in range(1, C + 1)
                        if C % tc == 0
                        and ((rpc * tc) % 8 == 0 or rpc * tc == R_total)})
        # A single whole channel is the minimum legal block even if it blows
        # the budget (channels cannot be split without halo support).
        cand = [rb for rb in legal if rb <= budget_rows] or [legal[0]]
        if B == 1:
            # Keep >= 2 grid steps so both v7x TensorCores get work.
            split = [rb for rb in cand if R_total // rb >= 2]
            if split:
                cand = split
        Rb = cand[-1]                               # largest block that fits
    num_row_blocks = R_total // Rb

    # ---- pack tiny samples to amortize the ~0.35us/grid-step overhead -------
    Bt = 1
    per_sample_bytes = R_total * 128 * itemsize
    if num_row_blocks == 1 and B >= 4 and 4 * per_sample_bytes <= block_budget:
        for cand_bt in range(2, B + 1):
            if (B % cand_bt == 0 and B // cand_bt >= 2
                    and cand_bt * per_sample_bytes <= block_budget):
                Bt = cand_bt                        # keep >= 2 batch steps

    # ---- VMEM budget: double-buffered IO + the kernel's real live set -------
    # (x_f32, shifted, two roll candidates, acc, row_acc, masks, band/D) with
    # generous margin, capped below physical VMEM minus 16 MiB headroom.
    f32_slab = Rb * 128 * 4
    io_block = Bt * Rb * 128 * itemsize
    live_est = 4 * io_block + 16 * f32_slab + (2 << 20)
    vmem_limit = int(max(16 << 20, min(live_est, vmem_cap - (16 << 20))))

    kernel = functools.partial(_random_filter_kernel, k=k, H=H, W=W, Rb=Rb,
                               Bt=Bt, fix_nan=fix_nan)
    out_fold = pl.pallas_call(
        kernel,
        out_shape=jax.ShapeDtypeStruct((B, R_total, 128), img.dtype),
        grid_spec=pltpu.PrefetchScalarGridSpec(
            num_scalar_prefetch=1,                  # taps live in SMEM
            grid=(B // Bt, num_row_blocks),
            in_specs=[pl.BlockSpec((Bt, Rb, 128),
                                   lambda b, ct, w_taps: (b, ct, 0))],
            out_specs=pl.BlockSpec((Bt, Rb, 128),
                                   lambda b, ct, w_taps: (b, ct, 0)),
        ),
        compiler_params=pltpu.CompilerParams(
            dimension_semantics=("parallel", "parallel"),
            vmem_limit_bytes=vmem_limit),
    )(w_flat, x_fold)

    return out_fold.reshape(B, C, H, W)


def _reference(img, conv_weight, kernel_size):
    """Pure-JAX reference with identical tap semantics (for validation)."""
    B, C, H, W = img.shape
    k = kernel_size
    pad = k // 2
    x_pad = jnp.pad(img, ((0, 0), (0, 0), (pad, pad), (pad, pad)))
    acc = jnp.zeros((B, C, H, W), jnp.float32)
    for ky in range(k):
        for kx in range(k):
            tap = conv_weight[:, ky, kx][:, None, None, None]
            acc = acc + tap * x_pad[:, :, ky:ky + H, kx:kx + W]
    acc = jnp.where(jnp.isnan(acc), 1.0, acc)
    return jnp.clip(acc, 0.0, 1.0)


if __name__ == "__main__":
    # Module config (deterministic, synthetic): RandomFilter(kernel_size=3, sigma=0.1)
    kernel_size = 3
    sigma = 0.1

    B, C, H, W = 2, 4, 16, 16
    key = jax.random.PRNGKey(0)
    k_img, k_w = jax.random.split(key)

    # Inputs are images in [0, 1] (the module clamps the output to that range).
    img = jax.random.uniform(k_img, (B, C, H, W), dtype=jnp.float32)

    # conv_weight = sigma * randn(B, k, k) + delta, delta[center, center] = 1.0
    # center = int(np.ceil(k / 2)) == 2 for k == 3, exactly as in the torch code.
    center = int(np.ceil(kernel_size / 2))
    delta = jnp.zeros((kernel_size, kernel_size), jnp.float32)
    delta = delta.at[center, center].set(1.0)
    conv_weight = (sigma * jax.random.normal(k_w, (B, kernel_size, kernel_size),
                                             dtype=jnp.float32) + delta[None])

    out = random_filter_forward(img, conv_weight, kernel_size)
    out = jax.block_until_ready(out)

    ref = _reference(img, conv_weight, kernel_size)
    assert out.shape == (B, C, H, W)
    # Tolerance note: the horizontal taps are evaluated as an f32 MXU matmul;
    # depending on the generation's f32 pass decomposition this can be a few
    # 1e-3 off the pure-VPU reference, while any structural bug (wrong shift,
    # mask or tap) produces >= 1e-2 errors.
    np.testing.assert_allclose(np.asarray(out), np.asarray(ref),
                               rtol=5e-3, atol=5e-3)
    print("KERNEL_OK")
</pallas_src>

<mosaic_0001>
module attributes {stable_mosaic.version = 11 : i64} {
  func.func @_random_filter_kernel(%arg0: i32, %arg1: i32, %arg2: memref<18xf32, #tpu.memory_space<smem>>, %arg3: memref<1x8x128xf32, #tpu.memory_space<vmem>>, %arg4: memref<1x8x128xf32, #tpu.memory_space<vmem>>) attributes {dimension_semantics = [#tpu.dimension_semantics<parallel>, #tpu.dimension_semantics<parallel>], iteration_bounds = array<i64: 2, 1>, scalar_prefetch = 1 : i64, scratch_operands = 0 : i64, tpu.core_type = #tpu.core_type<tc>, window_params = [{transform_indices = @transform_0, window_bounds = array<i64: 1, 8, 128>}, {transform_indices = @transform_1, window_bounds = array<i64: 1, 8, 128>}]} {
    %c1_i32 = arith.constant 1 : i32
    %0 = arith.muli %arg0, %c1_i32 : i32
    %1 = tpu.iota {dimensions = array<i32: 0>} : vector<128x128xi32>
    %2 = tpu.iota {dimensions = array<i32: 1>} : vector<128x128xi32>
    %c4_i32 = arith.constant 4 : i32
    %3 = vector.broadcast %c4_i32 : i32 to vector<128x128xi32>
    %4 = arith.shrsi %1, %3 : vector<128x128xi32>
    %c4_i32_0 = arith.constant 4 : i32
    %5 = vector.broadcast %c4_i32_0 : i32 to vector<128x128xi32>
    %6 = arith.shrsi %2, %5 : vector<128x128xi32>
    %7 = arith.cmpi eq, %4, %6 : vector<128x128xi32>
    %8 = arith.subi %1, %2 : vector<128x128xi32>
    %c-1_i32 = arith.constant -1 : i32
    %9 = vector.broadcast %c-1_i32 : i32 to vector<128x128xi32>
    %10 = arith.cmpi eq, %8, %9 : vector<128x128xi32>
    %11 = arith.andi %7, %10 : vector<128x128xi1>
    %12 = arith.extui %11 : vector<128x128xi1> to vector<128x128xi32>
    %13 = arith.sitofp %12 : vector<128x128xi32> to vector<128x128xf32>
    %14 = arith.subi %1, %2 : vector<128x128xi32>
    %c0_i32 = arith.constant 0 : i32
    %15 = vector.broadcast %c0_i32 : i32 to vector<128x128xi32>
    %16 = arith.cmpi eq, %14, %15 : vector<128x128xi32>
    %17 = arith.andi %7, %16 : vector<128x128xi1>
    %18 = arith.extui %17 : vector<128x128xi1> to vector<128x128xi32>
    %19 = arith.sitofp %18 : vector<128x128xi32> to vector<128x128xf32>
    %20 = arith.subi %1, %2 : vector<128x128xi32>
    %c1_i32_1 = arith.constant 1 : i32
    %21 = vector.broadcast %c1_i32_1 : i32 to vector<128x128xi32>
    %22 = arith.cmpi eq, %20, %21 : vector<128x128xi32>
    %23 = arith.andi %7, %22 : vector<128x128xi1>
    %24 = arith.extui %23 : vector<128x128xi1> to vector<128x128xi32>
    %25 = arith.sitofp %24 : vector<128x128xi32> to vector<128x128xf32>
    %26 = tpu.iota {dimensions = array<i32: 0>} : vector<8x128xi32>
    %27 = tpu.iota {dimensions = array<i32: 1>} : vector<8x128xi32>
    %c8_i32 = arith.constant 8 : i32
    %28 = vector.broadcast %c8_i32 : i32 to vector<8x128xi32>
    %29 = arith.muli %26, %28 : vector<8x128xi32>
    %c4_i32_2 = arith.constant 4 : i32
    %30 = vector.broadcast %c4_i32_2 : i32 to vector<8x128xi32>
    %31 = arith.shrsi %27, %30 : vector<8x128xi32>
    %32 = arith.addi %29, %31 : vector<8x128xi32>
    %c15_i32 = arith.constant 15 : i32
    %33 = vector.broadcast %c15_i32 : i32 to vector<8x128xi32>
    %34 = arith.andi %32, %33 : vector<8x128xi32>
    %c16_i32 = arith.constant 16 : i32
    %35 = vector.broadcast %c16_i32 : i32 to vector<8x128xi32>
    %36 = arith.cmpi slt, %27, %35 : vector<8x128xi32>
    %c1_i32_3 = arith.constant 1 : i32
    %37 = vector.broadcast %c1_i32_3 : i32 to vector<8x128xi32>
    %38 = arith.cmpi sge, %34, %37 : vector<8x128xi32>
    %c112_i32 = arith.constant 112 : i32
    %39 = vector.broadcast %c112_i32 : i32 to vector<8x128xi32>
    %40 = arith.cmpi slt, %27, %39 : vector<8x128xi32>
    %c15_i32_4 = arith.constant 15 : i32
    %41 = vector.broadcast %c15_i32_4 : i32 to vector<8x128xi32>
    %42 = arith.cmpi slt, %34, %41 : vector<8x128xi32>
    %c0_i32_5 = arith.constant 0 : i32
    %43 = arith.addi %0, %c0_i32_5 : i32
    %c0 = arith.constant 0 : index
    %c0_6 = arith.constant 0 : index
    %c0_7 = arith.constant 0 : index
    %44 = vector.load %arg3[%c0, %c0_6, %c0_7] : memref<1x8x128xf32, #tpu.memory_space<vmem>>, vector<1x8x128xf32>
    %45 = vector.shape_cast %44 : vector<1x8x128xf32> to vector<8x128xf32>
    %cst = arith.constant 0.000000e+00 : f32
    %46 = vector.broadcast %cst : f32 to vector<8x128xf32>
    %c1_i32_8 = arith.constant 1 : i32
    %47 = tpu.dynamic_rotate %45 by %c1_i32_8 dim 0 : vector<8x128xf32>, i32 -> vector<8x128xf32>
    %c16_i32_9 = arith.constant 16 : i32
    %48 = tpu.dynamic_rotate %47 by %c16_i32_9 dim 1 : vector<8x128xf32>, i32 -> vector<8x128xf32>
    %c16_i32_10 = arith.constant 16 : i32
    %49 = tpu.dynamic_rotate %45 by %c16_i32_10 dim 1 : vector<8x128xf32>, i32 -> vector<8x128xf32>
    %50 = arith.select %36, %48, %49 : vector<8x128xi1>, vector<8x128xf32>
    %c9_i32 = arith.constant 9 : i32
    %51 = arith.muli %43, %c9_i32 : i32
    %c0_i32_11 = arith.constant 0 : i32
    %52 = arith.addi %51, %c0_i32_11 : i32
    %53 = arith.index_cast %52 : i32 to index
    %54 = memref.load %arg2[%53] : memref<18xf32, #tpu.memory_space<smem>>
    %55 = vector.broadcast %54 : f32 to vector<128x128xf32>
    %56 = arith.mulf %13, %55 : vector<128x128xf32>
    %c9_i32_12 = arith.constant 9 : i32
    %57 = arith.muli %43, %c9_i32_12 : i32
    %c0_i32_13 = arith.constant 0 : i32
    %58 = arith.addi %57, %c0_i32_13 : i32
    %c1_i32_14 = arith.constant 1 : i32
    %59 = arith.addi %58, %c1_i32_14 : i32
    %60 = arith.index_cast %59 : i32 to index
    %61 = memref.load %arg2[%60] : memref<18xf32, #tpu.memory_space<smem>>
    %62 = vector.broadcast %61 : f32 to vector<128x128xf32>
    %63 = arith.mulf %19, %62 : vector<128x128xf32>
    %64 = arith.addf %56, %63 : vector<128x128xf32>
    %c9_i32_15 = arith.constant 9 : i32
    %65 = arith.muli %43, %c9_i32_15 : i32
    %c0_i32_16 = arith.constant 0 : i32
    %66 = arith.addi %65, %c0_i32_16 : i32
    %c2_i32 = arith.constant 2 : i32
    %67 = arith.addi %66, %c2_i32 : i32
    %68 = arith.index_cast %67 : i32 to index
    %69 = memref.load %arg2[%68] : memref<18xf32, #tpu.memory_space<smem>>
    %70 = vector.broadcast %69 : f32 to vector<128x128xf32>
    %71 = arith.mulf %25, %70 : vector<128x128xf32>
    %72 = arith.addf %64, %71 : vector<128x128xf32>
    %cst_17 = arith.constant dense<0.000000e+00> : vector<8x128xf32>
    %73 = tpu.matmul %50, %72, %cst_17 {dimension_numbers = #tpu.dot_dimension_numbers<[1], [0], [0], [1], [0, 0, 1, 1], [], []>} : vector<8x128xf32>, vector<128x128xf32>, vector<8x128xf32> -> vector<8x128xf32>
    %cst_18 = arith.constant 0.000000e+00 : f32
    %74 = vector.broadcast %cst_18 : f32 to vector<8x128xf32>
    %75 = arith.select %38, %73, %74 : vector<8x128xi1>, vector<8x128xf32>
    %76 = arith.addf %46, %75 : vector<8x128xf32>
    %c9_i32_19 = arith.constant 9 : i32
    %77 = arith.muli %43, %c9_i32_19 : i32
    %c3_i32 = arith.constant 3 : i32
    %78 = arith.addi %77, %c3_i32 : i32
    %79 = arith.index_cast %78 : i32 to index
    %80 = memref.load %arg2[%79] : memref<18xf32, #tpu.memory_space<smem>>
    %81 = vector.broadcast %80 : f32 to vector<128x128xf32>
    %82 = arith.mulf %13, %81 : vector<128x128xf32>
    %c9_i32_20 = arith.constant 9 : i32
    %83 = arith.muli %43, %c9_i32_20 : i32
    %c3_i32_21 = arith.constant 3 : i32
    %84 = arith.addi %83, %c3_i32_21 : i32
    %c1_i32_22 = arith.constant 1 : i32
    %85 = arith.addi %84, %c1_i32_22 : i32
    %86 = arith.index_cast %85 : i32 to index
    %87 = memref.load %arg2[%86] : memref<18xf32, #tpu.memory_space<smem>>
    %88 = vector.broadcast %87 : f32 to vector<128x128xf32>
    %89 = arith.mulf %19, %88 : vector<128x128xf32>
    %90 = arith.addf %82, %89 : vector<128x128xf32>
    %c9_i32_23 = arith.constant 9 : i32
    %91 = arith.muli %43, %c9_i32_23 : i32
    %c3_i32_24 = arith.constant 3 : i32
    %92 = arith.addi %91, %c3_i32_24 : i32
    %c2_i32_25 = arith.constant 2 : i32
    %93 = arith.addi %92, %c2_i32_25 : i32
    %94 = arith.index_cast %93 : i32 to index
    %95 = memref.load %arg2[%94] : memref<18xf32, #tpu.memory_space<smem>>
    %96 = vector.broadcast %95 : f32 to vector<128x128xf32>
    %97 = arith.mulf %25, %96 : vector<128x128xf32>
    %98 = arith.addf %90, %97 : vector<128x128xf32>
    %cst_26 = arith.constant dense<0.000000e+00> : vector<8x128xf32>
    %99 = tpu.matmul %45, %98, %cst_26 {dimension_numbers = #tpu.dot_dimension_numbers<[1], [0], [0], [1], [0, 0, 1, 1], [], []>} : vector<8x128xf32>, vector<128x128xf32>, vector<8x128xf32> -> vector<8x128xf32>
    %100 = arith.addf %76, %99 : vector<8x128xf32>
    %c112_i32_27 = arith.constant 112 : i32
    %101 = tpu.dynamic_rotate %45 by %c112_i32_27 dim 1 : vector<8x128xf32>, i32 -> vector<8x128xf32>
    %c7_i32 = arith.constant 7 : i32
    %102 = tpu.dynamic_rotate %45 by %c7_i32 dim 0 : vector<8x128xf32>, i32 -> vector<8x128xf32>
    %c112_i32_28 = arith.constant 112 : i32
    %103 = tpu.dynamic_rotate %102 by %c112_i32_28 dim 1 : vector<8x128xf32>, i32 -> vector<8x128xf32>
    %104 = arith.select %40, %101, %103 : vector<8x128xi1>, vector<8x128xf32>
    %c9_i32_29 = arith.constant 9 : i32
    %105 = arith.muli %43, %c9_i32_29 : i32
    %c6_i32 = arith.constant 6 : i32
    %106 = arith.addi %105, %c6_i32 : i32
    %107 = arith.index_cast %106 : i32 to index
    %108 = memref.load %arg2[%107] : memref<18xf32, #tpu.memory_space<smem>>
    %109 = vector.broadcast %108 : f32 to vector<128x128xf32>
    %110 = arith.mulf %13, %109 : vector<128x128xf32>
    %c9_i32_30 = arith.constant 9 : i32
    %111 = arith.muli %43, %c9_i32_30 : i32
    %c6_i32_31 = arith.constant 6 : i32
    %112 = arith.addi %111, %c6_i32_31 : i32
    %c1_i32_32 = arith.constant 1 : i32
    %113 = arith.addi %112, %c1_i32_32 : i32
    %114 = arith.index_cast %113 : i32 to index
    %115 = memref.load %arg2[%114] : memref<18xf32, #tpu.memory_space<smem>>
    %116 = vector.broadcast %115 : f32 to vector<128x128xf32>
    %117 = arith.mulf %19, %116 : vector<128x128xf32>
    %118 = arith.addf %110, %117 : vector<128x128xf32>
    %c9_i32_33 = arith.constant 9 : i32
    %119 = arith.muli %43, %c9_i32_33 : i32
    %c6_i32_34 = arith.constant 6 : i32
    %120 = arith.addi %119, %c6_i32_34 : i32
    %c2_i32_35 = arith.constant 2 : i32
    %121 = arith.addi %120, %c2_i32_35 : i32
    %122 = arith.index_cast %121 : i32 to index
    %123 = memref.load %arg2[%122] : memref<18xf32, #tpu.memory_space<smem>>
    %124 = vector.broadcast %123 : f32 to vector<128x128xf32>
    %125 = arith.mulf %25, %124 : vector<128x128xf32>
    %126 = arith.addf %118, %125 : vector<128x128xf32>
    %cst_36 = arith.constant dense<0.000000e+00> : vector<8x128xf32>
    %127 = tpu.matmul %104, %126, %cst_36 {dimension_numbers = #tpu.dot_dimension_numbers<[1], [0], [0], [1], [0, 0, 1, 1], [], []>} : vector<8x128xf32>, vector<128x128xf32>, vector<8x128xf32> -> vector<8x128xf32>
    %cst_37 = arith.constant 0.000000e+00 : f32
    %128 = vector.broadcast %cst_37 : f32 to vector<8x128xf32>
    %129 = arith.select %42, %127, %128 : vector<8x128xi1>, vector<8x128xf32>
    %130 = arith.addf %100, %129 : vector<8x128xf32>
    %131 = arith.cmpf one, %130, %130 : vector<8x128xf32>
    %cst_38 = arith.constant 1.000000e+00 : f32
    %132 = vector.broadcast %cst_38 : f32 to vector<8x128xf32>
    %133 = arith.select %131, %132, %130 : vector<8x128xi1>, vector<8x128xf32>
    %cst_39 = arith.constant 0.000000e+00 : f32
    %cst_40 = arith.constant 1.000000e+00 : f32
    %134 = vector.broadcast %cst_39 : f32 to vector<8x128xf32>
    %135 = arith.maximumf %134, %133 : vector<8x128xf32>
    %136 = vector.broadcast %cst_40 : f32 to vector<8x128xf32>
    %137 = arith.minimumf %136, %135 : vector<8x128xf32>
    %c0_41 = arith.constant 0 : index
    %c0_42 = arith.constant 0 : index
    %c0_43 = arith.constant 0 : index
    %138 = vector.load %arg4[%c0_41, %c0_42, %c0_43] : memref<1x8x128xf32, #tpu.memory_space<vmem>>, vector<1x8x128xf32>
    %139 = vector.shape_cast %138 : vector<1x8x128xf32> to vector<8x128xf32>
    %140 = vector.shape_cast %137 : vector<8x128xf32> to vector<1x8x128xf32>
    tpu.vector_store %arg4[%c0_41, %c0_42, %c0_43], %140 {strides = array<i32>} : memref<1x8x128xf32, #tpu.memory_space<vmem>>, vector<1x8x128xf32>,
    return
  }
  func.func @transform_0(%arg0: i32, %arg1: i32, %arg2: memref<18xf32, #tpu.memory_space<smem>>) -> (i32, i32, i32) {
    %c0_i32 = arith.constant 0 : i32
    %c0_i32_0 = arith.constant 0 : i32
    return %arg0, %arg1, %c0_i32 : i32, i32, i32
  }
  func.func @transform_1(%arg0: i32, %arg1: i32, %arg2: memref<18xf32, #tpu.memory_space<smem>>) -> (i32, i32, i32) {
    %c0_i32 = arith.constant 0 : i32
    %c0_i32_0 = arith.constant 0 : i32
    return %arg0, %arg1, %c0_i32 : i32, i32, i32
  }
}

</mosaic_0001>

<bundles_post_ra>
// kernel: tpu_custom_call.1
= control target key start
LH: loop header
LB: loop body
LE: loop exit
PB: predicated region body
PF: predicated region fallthrough
CT: control target
= control target key end

     0   :  { %s1430_s9 = smov [#allocation3]   ;;  %s2415_s0 = inlined_call_operand.hbm [shape: f32[18], index: 0, kind: input, shape index: {}]   ;;  %s2416_s1 = inlined_call_operand.hbm [shape: f32[2,8,128], index: 1, kind: input, shape index: {}]   ;;  %s2417_s2 = inlined_call_operand.hbm [shape: f32[2,8,128], index: 2, kind: output, shape index: {}]  }
   0x1   :  { %8 = dma.hbm_to_smem %s2415_s0, 16, %s1430_s9, [#allocation2] }
   0x2   :  { %1396 = dma.done.wait [#allocation2], 16 }
   0x3   :  { %1397 = vsyncadd [#allocation2], 4294967280 }
   0x4   :  { %10 = sfence }
   0x5   :  { %11 = vsyncpa [#allocation5], 0 }
   0x6   :  { %13 = vsyncpa [#allocation5 + $0x1], 0 }
   0x7   :  { %14 = vsyncpa [#allocation6], 0 }
   0x8   :  { %16 = vsyncpa [#allocation6 + $0x1], 0  ;;  %s1455_s12 = smov 0   ;;  %s1457_s13 = smov 0  }
   0x9   :  { %s1459_s14 = smov 0   ;;  %s1461_s15 = smov 0  }
   0xa   :  { %s1463_s16 = smov 0   ;;  %s1465_s17 = smov 0  }
   0xb LB: > { %s1016_s0 = sadd.s32 4294967295, %s1428_s17   ;;  %s1017_s18 = sadd.s32 4294967294, %s1428_s17   ;;  %s1428_s17 = sphi %s1465_s17, %s22_s17   ;;  %s1424_s16 = sphi %s1463_s16, %s2492_s16   ;;  %s1420_s15 = sphi %s1461_s15, %s2491_s15   ;;  %s1416_s14 = sphi %s1459_s14, %s2490_s14   ;;  %s1412_s13 = sphi %s1457_s13, %s2489_s13   ;;  %s1408_s12 = sphi %s1455_s12, %s2488_s12  }
   0xc   : > { %s34_s19 = sadd.s32 1, %s1424_s16  ;;  %s43_s20 = sadd.s32 1, %s1416_s14 }
   0xd   : > { %p36_p0 = scmp.ge.s32.totalorder %s34_s19, 2  ;;  %p50_p1 = scmp.ne.s32.totalorder %s1416_s14, %s1412_s13 }
   0xe   : > { %p51_p2 = scmp.eq.s32.totalorder %s1428_s17, 0  ;;  %p56_p3 = scmp.ne.s32.totalorder %s1412_s13, %s1408_s12 }
   0xf   : > { %s2494_s19 = smov (%p36_p0, %s34_s19), 0  ;;  %p57_p5 = scmp.eq.s32.totalorder %s1016_s0, 0 }
  0x10   : > { %p1496_p4 = por %p51_p2, %p50_p1  ;;  %s38_s22 = ssub.s32 %s1424_s16, %s2494_s19 }
  0x11   : > { %p82_p6 = scmp.eq.s32.totalorder %s1016_s0, 1  ;;  %p41_p7 = scmp.eq.s32.totalorder %s38_s22, 0 }
  0x12   : > { %p1502_p8 = por %p57_p5, %p56_p3  ;;  %p88_p10 = scmp.eq.s32.totalorder %s1017_s18, 1 }
  0x13   : > { %p1506_p9 = por %p82_p6, %p50_p1  ;;  %p1245_p13 = scmp.lt.s32.totalorder %s1428_s17, 2 }
  0x14   : > { %s1511_s25 = scalar_select %p41_p7, %s1416_s14, %s43_s20  }
  0x15   : > { %p1513_p11 = por %p88_p10, %p56_p3  ;;  %s108_s27 = sand.u32 1, %s1416_s14  }
  0x16   : > { %s1020_s28 = sshll.u32 %s108_s27, 3  ;;  %s1021_s29 = sshll.u32 %s1424_s16, 7 }
  0x17   : > { %s2432_s26 = scalar_select %p1513_p11, 1, 0 }
  0x18   : > { %s118_s4 = scalar_lea.hbm %s2416_s1, %s1021_s29  ;;  %s112_s5 = scalar_lea.vmem [#allocation4], %s1020_s28 }
  0x19   : > { %s120_s6 = sshll.u32 %s112_s5, 4  ;;  %p1526_p0 = pnand %p1245_p13, %p1496_p4  ;;  %s121_s6 = int_to_ptr.vmem [resolvable:$true] %s120_s6 }
  0x1a   : > { %p1022_p1 = scmp.ge.s32.totalorder %s1428_s17, 1  ;;  %p125_p2 = scmp.lt.s32.totalorder %s1428_s17, 3 }
  0x1b   : > { %s109_s8 = scalar_lea.sflag [#allocation5], %s108_s27  ;;  %p1320_p3 = pneg %p1526_p0 }
  0x1c   : > { %s1331_s9 = scalar_lea.vmem %s121_s6, 128  ;;  %s1431_s10 = smov [#allocation4]  }
  0x1d   : > { %p1332_p5 = scmp.ne.s32.totalorder %s121_s6, %s1331_s9  ;;  %s1336_s11 = sshll.u32 %s1431_s10, 4  ;;  %s1337_s11 = int_to_ptr.vmem [resolvable:$false] %s1336_s11 }
  0x1e   : > { %s1338_s0 = scalar_lea.vmem %s1337_s11, 256  ;;  %p1339_p10 = scmp.lt.s32.totalorder %s121_s6, %s1337_s11 }
  0x1f   : > { %p1334_p6 = pnand %p1332_p5, %p1320_p3  ;;  %p1340_p12 = scmp.lt.s32.totalorder %s1338_s0, %s1331_s9 }
  0x21   : > { %p1335_p7 = pneg %p1334_p6  ;;  %p1341_p4 = por %p1340_p12, %p1339_p10 }
  0x23   : > { %p1342_p13 = pnand %p1341_p4, %p1335_p7 }
  0x25   : > { %1345 = shalt.err (!%p1342_p13)
}
  0x26   : > { %1240 = dma.hbm_to_vmem [thread:$0]  (!%p1526_p0), %s118_s4, 128, %s121_s6, %s109_s8  }
  0x27   : > { %p126_p11 = pnand %p1022_p1, %p125_p2 }
  0x29   : > { %129 = sbr.rel (%p126_p11) target bundleno = 426 (0x1aa), region = 24 }
  0x2e   : > { %s1541_s18 = sand.u32 1, %s1412_s13  }
  0x2f   : > { %s1023_s20 = sshll.u32 %s1541_s18, 3  ;;  %s132_s21 = scalar_lea.sflag [#allocation5], %s1541_s18 }
  0x30   : > { %s1547_s22 = scalar_lea.vmem [#allocation4], %s1023_s20 }
  0x31   : > { %1399 = dma.done.wait (%p1502_p8), %s132_s21, 128  }
  0x32   : > { %1401 = vsyncadd (%p1502_p8), %s132_s21, 4294967168  ;;  %s1554_s27 = smul.u32 9, %s1420_s15  ;;  %v154_v0 = vlaneseq  ;;  %v1432_v1 = vmov 0.0   ;;  %vm1433_vm0 = vmmov 0   ;;  %v1608_v16 = vld [vmem:[%s1547_s22] sm:$0xff] }
  0x33   : > { %1128 = vmatprep.subr.mxu0 %v1432_v1  ;;  %1163 = vmatprep.subr.mxu1 %v1432_v1  ;;  %v422_v22 = vrot.slane %v1608_v16, 7  ;;  %v751_v23 = vrot.slane %v1608_v16, 1 }
  0x34   : > { %s1559_s28 = sld [smem:[#allocation3 + %s1554_s27]]  ;;  %s447_s29 = sadd.s32 1, %s1554_s27  ;;  %v1562_v2 = vshrl.u32 %v154_v0, 7  ;;  %v1564_v3 = vand.u32 127, %v154_v0  ;;  %1160 = vmatprep.mubr.msk.f32.mxu0 %vm1433_vm0, %v1432_v1  ;;  %1195 = vmatprep.mubr.msk.f32.mxu1 %vm1433_vm0, %v1432_v1 }
  0x35   : > { %s1570_s23 = sld [smem:[#allocation3 + %s447_s29]]  ;;  %s482_s30 = sadd.s32 2, %s1554_s27  ;;  %v1300_v27 = vpack.i.bf16 %v1608_v16, %v422_v22  ;;  %v1305_v28 = vpack.i.bf16 %v751_v23, %v1608_v16 }
  0x36   : > { %2434 = vst [vmem:[#allocation11_spill] sm:$0xff] %v1562_v2  ;;  %2435 = vst [vmem:[#allocation12_spill] sm:$0xff] %v1564_v3  ;;  %s1573_s3 = sld [smem:[#allocation3 + %s482_s30]]  ;;  %s589_s4 = sadd.s32 3, %s1554_s27  ;;  %v170_v4 = vadd.s32 120, %v1562_v2  ;;  %v1578_v5 = vshra.s32 %v1564_v3, 4 }
  0x37   : > { %v169_v6 = vadd.s32 112, %v1562_v2  ;;  %v1582_v7 = vadd.s32 104, %v1562_v2  ;;  %s1584_s5 = sld [smem:[#allocation3 + %s589_s4]]  ;;  %s608_s6 = sadd.s32 4, %s1554_s27  ;;  %v1588_v8 = vadd.s32 96, %v1562_v2  ;;  %v1591_v9 = vadd.s32 88, %v1562_v2 }
  0x38   : > { %2436 = vst [vmem:[#allocation13_spill] sm:$0xff] %v1578_v5  ;;  %v1594_v10 = vadd.s32 80, %v1562_v2  ;;  %v1597_v11 = vadd.s32 72, %v1562_v2  ;;  %s1599_s7 = sld [smem:[#allocation3 + %s608_s6]]  ;;  %s643_s8 = sadd.s32 5, %s1554_s27  ;;  %v188_v12 = vshra.s32 %v170_v4, 4  ;;  %v221_v13 = vsub.s32 %v170_v4, %v1564_v3 }
  0x39   : > { %v187_v14 = vshra.s32 %v169_v6, 4  ;;  %v220_v15 = vsub.s32 %v169_v6, %v1564_v3  ;;  %s1604_s9 = sld [smem:[#allocation3 + %s643_s8]]  ;;  %s755_s10 = sadd.s32 6, %s1554_s27  ;;  %v186_v17 = vshra.s32 %v1582_v7, 4  ;;  %v1613_v18 = vsub.s32 %v1582_v7, %v1564_v3 }
  0x3a   : > { %v185_v19 = vshra.s32 %v1588_v8, 4  ;;  %v1618_v20 = vsub.s32 %v1588_v8, %v1564_v3  ;;  %v1621_v21 = vstv %s1559_s28  ;;  %s1623_s11 = sld [smem:[#allocation3 + %s755_s10]]  ;;  %s774_s0 = sadd.s32 7, %s1554_s27  ;;  %vm1629_vm1 = vcmp.eq.s32.totalorder %v188_v12, %v1578_v5 }
  0x3b   : > { %v1634_v25 = vstv %s1570_s23  ;;  %s1636_s21 = sld [smem:[#allocation3 + %s774_s0]]  ;;  %s809_s22 = sadd.s32 8, %s1554_s27  ;;  %vm237_vm2 = vcmp.eq.s32.totalorder %v221_v13, 4294967295  ;;  %vm301_vm3 = vcmp.eq.s32.totalorder %v221_v13, 0  ;;  %vm365_vm4 = vcmp.eq.s32.totalorder %v221_v13, 1 }
  0x3c   : > { %v1640_v26 = vstv %s1573_s3  ;;  %s1642_s28 = sld [smem:[#allocation3 + %s809_s22]]  ;;  %vm253_vm5 = vmand %vm1629_vm1, %vm237_vm2  ;;  %vm1649_vm6 = vcmp.eq.s32.totalorder %v187_v14, %v1578_v5  ;;  %vm236_vm8 = vcmp.eq.s32.totalorder %v220_v15, 4294967295  ;;  %vm300_vm9 = vcmp.eq.s32.totalorder %v220_v15, 0  ;;  %s1434_s27 = smov 16  }
  0x3d   : > { %v1654_v30 = vstv %s1584_s5  ;;  %v1040_v31 = vsel %vm253_vm5, 1.0, %v1432_v1  ;;  %vm317_vm7 = vmand %vm1629_vm1, %vm301_vm3  ;;  %1301 = vrot.lane.b32.xlu0 %v1300_v27, %s1434_s27  ;;  %vm364_vm11 = vcmp.eq.s32.totalorder %v220_v15, 1  ;;  %s1435_s29 = smov 112   ;;  %vm1718_vm15 = vcmp.eq.s32.totalorder %v186_v17, %v1578_v5  ;;  %s1074_s23 = sshll.u32 %s1420_s15, 7 }
  0x3e   : > { %v1660_v32 = vstv %s1599_s7  ;;  %v1056_v33 = vsel %vm317_vm7, 1.0, %v1432_v1  ;;  %vm381_vm10 = vmand %vm1629_vm1, %vm365_vm4  ;;  %v446_v34 = vmul.f32 %v1040_v31, %v1621_v21  ;;  %v607_v38 = vmul.f32 %v1040_v31, %v1654_v30  ;;  %s153_s30 = scalar_lea.vmem [#allocation7], %s1023_s20  ;;  %s934_s6 = scalar_lea.hbm %s2417_s2, %s1074_s23 }
  0x3f   : > { %v1668_v35 = vstv %s1604_s9  ;;  %v1072_v36 = vsel %vm381_vm10, 1.0, %v1432_v1  ;;  %v465_v37 = vmul.f32 %v1056_v33, %v1634_v25  ;;  %vm252_vm12 = vmand %vm1649_vm6, %vm236_vm8  ;;  %v626_v42 = vmul.f32 %v1056_v33, %v1660_v32  ;;  %s936_s3 = sshll.u32 %s153_s30, 4  ;;  %s922_s7 = scalar_lea.sflag [#allocation6], %s1541_s18  ;;  %s937_s3 = int_to_ptr.vmem [resolvable:$true] %s936_s3 }
  0x40   : > { %v1676_v39 = vstv %s1623_s11  ;;  %v500_v40 = vmul.f32 %v1072_v36, %v1640_v26  ;;  %v1680_v41 = vsel %vm252_vm12, 1.0, %v1432_v1  ;;  %vm316_vm13 = vmand %vm1649_vm6, %vm300_vm9  ;;  %v661_v56 = vmul.f32 %v1072_v36, %v1668_v35  ;;  %s1346_s8 = scalar_lea.vmem %s937_s3, 128  ;;  %s1436_s9 = smov [#allocation7]  }
  0x41   : > { %2441 = vst [vmem:[#allocation14_spill] sm:$0xff] %v1680_v41  ;;  %v1687_v43 = vstv %s1636_s21  ;;  %v481_v44 = vadd.f32 %v465_v37, %v446_v34  ;;  %v1690_v45 = vmul.f32 %v1040_v31, %v1676_v39  ;;  %v1693_v46 = vsel %vm316_vm13, 1.0, %v1432_v1  ;;  %vm380_vm14 = vmand %vm1649_vm6, %vm364_vm11  ;;  %1306 = vrot.lane.b32.xlu0 %v1305_v28, %s1435_s29  ;;  %p1347_p8 = scmp.ne.s32.totalorder %s937_s3, %s1346_s8  ;;  %s1350_s10 = sshll.u32 %s1436_s9, 4  ;;  %s1351_s10 = int_to_ptr.vmem [resolvable:$false] %s1350_s10 }
  0x42   : > { %2442 = vst [vmem:[#allocation15_spill] sm:$0xff] %v1693_v46  ;;  %v1699_v47 = vstv %s1642_s28  ;;  %v1702_v48 = vmul.f32 %v1056_v33, %v1687_v43  ;;  %v1705_v49 = vsel %vm380_vm14, 1.0, %v1432_v1  ;;  %v445_v50 = vmul.f32 %v1680_v41, %v1621_v21  ;;  %s1352_s15 = scalar_lea.vmem %s1351_s10, 256  ;;  %p1353_p0 = scmp.lt.s32.totalorder %s937_s3, %s1351_s10 }
  0x43   : > { %2443 = vst [vmem:[#allocation16_spill] sm:$0xff] %v1705_v49  ;;  %v516_v51 = vadd.f32 %v500_v40, %v481_v44  ;;  %v1710_v52 = vmul.f32 %v1072_v36, %v1699_v47  ;;  %v464_v53 = vmul.f32 %v1693_v46, %v1634_v25  ;;  %v499_v54 = vmul.f32 %v1705_v49, %v1640_v26  ;;  %p1348_p11 = pnand %p1347_p8, %p1506_p9  ;;  %p1354_p1 = scmp.lt.s32.totalorder %s1352_s15, %s1346_s8 }
  0x44   : > { %v642_v55 = vadd.f32 %v626_v42, %v607_v38  ;;  %vm235_vm1 = vcmp.eq.s32.totalorder %v1613_v18, 4294967295  ;;  %vm299_vm3 = vcmp.eq.s32.totalorder %v1613_v18, 0  ;;  %vm363_vm4 = vcmp.eq.s32.totalorder %v1613_v18, 1 }
  0x45   : > { %1129 = vmatpush3.msra.mxu0 %v516_v51  ;;  %v480_v58 = vadd.f32 %v464_v53, %v445_v50  ;;  %vm251_vm2 = vmand %vm1718_vm15, %vm235_vm1  ;;  %v606_v59 = vmul.f32 %v1680_v41, %v1654_v30  ;;  %v625_v62 = vmul.f32 %v1693_v46, %v1660_v32  ;;  %v660_v63 = vmul.f32 %v1705_v49, %v1668_v35  ;;  %p1349_p12 = pneg %p1348_p11  ;;  %p1355_p2 = por %p1354_p1, %p1353_p0 }
  0x46   : > { %1130 = vmatprep.subr.mxu0 %v1432_v1  ;;  %v677_v60 = vadd.f32 %v661_v56, %v642_v55  ;;  %v1731_v61 = vsel %vm251_vm2, 1.0, %v1432_v1  ;;  %vm315_vm5 = vmand %vm1718_vm15, %vm299_vm3  ;;  %vm1749_vm7 = vcmp.eq.s32.totalorder %v185_v19, %v1578_v5  ;;  %vm234_vm8 = vcmp.eq.s32.totalorder %v1618_v20, 4294967295 }
  0x47   : > { %2446 = vst [vmem:[#allocation17_spill] sm:$0xff] %v1731_v61  ;;  %v515_v0 = vadd.f32 %v499_v54, %v480_v58  ;;  %v1740_v4 = vsel %vm315_vm5, 1.0, %v1432_v1  ;;  %vm379_vm6 = vmand %vm1718_vm15, %vm363_vm4  ;;  %v444_v6 = vmul.f32 %v1731_v61, %v1621_v21  ;;  %v641_v14 = vadd.f32 %v625_v62, %v606_v59  ;;  %p1356_p3 = pnand %p1355_p2, %p1349_p12 }
  0x48   : > { %2447 = vst [vmem:[#allocation18_spill] sm:$0xff] %v1740_v4  ;;  %1164 = vmatpush3.msra.mxu1 %v677_v60  ;;  %v1754_v12 = vsel %vm379_vm6, 1.0, %v1432_v1  ;;  %v463_v13 = vmul.f32 %v1740_v4, %v1634_v25  ;;  %vm250_vm9 = vmand %vm1749_vm7, %vm234_vm8  ;;  %vm298_vm10 = vcmp.eq.s32.totalorder %v1618_v20, 0  ;;  %vm362_vm11 = vcmp.eq.s32.totalorder %v1618_v20, 1 }
  0x49   : > { %2450 = vst [vmem:[#allocation19_spill] sm:$0xff] %v1754_v12  ;;  %1131 = vmatpush3.msra.mxu0 %v515_v0  ;;  %1165 = vmatprep.subr.mxu1 %v1432_v1  ;;  %v498_v8 = vmul.f32 %v1754_v12, %v1640_v26  ;;  %v605_v15 = vmul.f32 %v1731_v61, %v1654_v30  ;;  %v1770_v19 = vsel %vm250_vm9, 1.0, %v1432_v1  ;;  %vm314_vm12 = vmand %vm1749_vm7, %vm298_vm10  ;;  %v184_v27 = vshra.s32 %v1591_v9, 4 }
  0x4a   : > { %1132 = vmatprep.subr.mxu0 %v1432_v1  ;;  %v479_v17 = vadd.f32 %v463_v13, %v444_v6  ;;  %v676_v18 = vadd.f32 %v660_v63, %v641_v14  ;;  %v624_v22 = vmul.f32 %v1740_v4, %v1660_v32  ;;  %v1777_v23 = vsel %vm314_vm12, 1.0, %v1432_v1  ;;  %vm378_vm13 = vmand %vm1749_vm7, %vm362_vm11 }
  0x4b   : > { %v443_v20 = vmul.f32 %v1770_v19, %v1621_v21  ;;  %v659_v24 = vmul.f32 %v1754_v12, %v1668_v35  ;;  %v1787_v29 = vsel %vm378_vm13, 1.0, %v1432_v1  ;;  %v462_v31 = vmul.f32 %v1777_v23, %v1634_v25 }
  0x4c   : > { %v514_v28 = vadd.f32 %v498_v8, %v479_v17  ;;  %1166 = vmatpush3.msra.mxu1 %v676_v18  ;;  %v640_v33 = vadd.f32 %v624_v22, %v605_v15  ;;  %v497_v34 = vmul.f32 %v1787_v29, %v1640_v26  ;;  %vm1795_vm14 = vcmp.eq.s32.totalorder %v184_v27, %v1578_v5 }
  0x4d   : > { %1167 = vmatprep.subr.mxu1 %v1432_v1  ;;  %v217_v37 = vsub.s32 %v1591_v9, %v1564_v3  ;;  %v604_v38 = vmul.f32 %v1770_v19, %v1654_v30  ;;  %v478_v40 = vadd.f32 %v462_v31, %v443_v20  ;;  %v623_v44 = vmul.f32 %v1777_v23, %v1660_v32 }
  0x4e   : > { %1133 = vmatpush3.msra.mxu0 %v514_v28  ;;  %v675_v42 = vadd.f32 %v659_v24, %v640_v33  ;;  %v658_v50 = vmul.f32 %v1787_v29, %v1668_v35  ;;  %v183_v51 = vshra.s32 %v1594_v10, 4  ;;  %v216_v54 = vsub.s32 %v1594_v10, %v1564_v3 }
  0x4f   : > { %1134 = vmatprep.subr.mxu0 %v1432_v1  ;;  %vm233_vm15 = vcmp.eq.s32.totalorder %v217_v37, 4294967295  ;;  %vm297_vm1 = vcmp.eq.s32.totalorder %v217_v37, 0  ;;  %vm361_vm2 = vcmp.eq.s32.totalorder %v217_v37, 1  ;;  %v513_v9 = vadd.f32 %v497_v34, %v478_v40 }
  0x50   : > { %1168 = vmatpush3.msra.mxu1 %v675_v42  ;;  %vm249_vm3 = vmand %vm1795_vm14, %vm233_vm15  ;;  %v639_v53 = vadd.f32 %v623_v44, %v604_v38  ;;  %v182_v55 = vshra.s32 %v1597_v11, 4  ;;  %vm1821_vm5 = vcmp.eq.s32.totalorder %v183_v51, %v1578_v5  ;;  %v215_v58 = vsub.s32 %v1597_v11, %v1564_v3 }
  0x51   : > { %1169 = vmatprep.subr.mxu1 %v1432_v1  ;;  %v1816_v56 = vsel %vm249_vm3, 1.0, %v1432_v1  ;;  %vm313_vm4 = vmand %vm1795_vm14, %vm297_vm1  ;;  %v163_v10 = vadd.s32 64, %v1562_v2  ;;  %1135 = vmatpush3.msra.mxu0 %v513_v9  ;;  %vm232_vm7 = vcmp.eq.s32.totalorder %v216_v54, 4294967295  ;;  %vm296_vm9 = vcmp.eq.s32.totalorder %v216_v54, 0 }
  0x52   : > { %v1829_v59 = vsel %vm313_vm4, 1.0, %v1432_v1  ;;  %vm377_vm6 = vmand %vm1795_vm14, %vm361_vm2  ;;  %v442_v60 = vmul.f32 %v1816_v56, %v1621_v21  ;;  %v674_v62 = vadd.f32 %v658_v50, %v639_v53  ;;  %1136 = vmatprep.subr.mxu0 %v1432_v1  ;;  %vm360_vm10 = vcmp.eq.s32.totalorder %v216_v54, 1 }
  0x53   : > { %v1838_v63 = vsel %vm377_vm6, 1.0, %v1432_v1  ;;  %v461_v11 = vmul.f32 %v1829_v59, %v1634_v25  ;;  %vm248_vm8 = vmand %vm1821_vm5, %vm232_vm7  ;;  %v603_v7 = vmul.f32 %v1816_v56, %v1654_v30  ;;  %v622_v13 = vmul.f32 %v1829_v59, %v1660_v32 }
  0x54   : > { %v496_v0 = vmul.f32 %v1838_v63, %v1640_v26  ;;  %1170 = vmatpush3.msra.mxu1 %v674_v62  ;;  %v1847_v6 = vsel %vm248_vm8, 1.0, %v1432_v1  ;;  %vm312_vm11 = vmand %vm1821_vm5, %vm296_vm9  ;;  %v657_v17 = vmul.f32 %v1838_v63, %v1668_v35  ;;  %vm1871_vm13 = vcmp.eq.s32.totalorder %v182_v55, %v1578_v5 }
  0x55   : > { %v477_v14 = vadd.f32 %v461_v11, %v442_v60  ;;  %1171 = vmatprep.subr.mxu1 %v1432_v1  ;;  %v1857_v8 = vsel %vm312_vm11, 1.0, %v1432_v1  ;;  %vm376_vm12 = vmand %vm1821_vm5, %vm360_vm10  ;;  %v441_v15 = vmul.f32 %v1847_v6, %v1621_v21  ;;  %v638_v20 = vadd.f32 %v622_v13, %v603_v7 }
  0x56   : > { %v1866_v18 = vsel %vm376_vm12, 1.0, %v1432_v1  ;;  %v460_v22 = vmul.f32 %v1857_v8, %v1634_v25  ;;  %vm231_vm14 = vcmp.eq.s32.totalorder %v215_v58, 4294967295  ;;  %vm295_vm15 = vcmp.eq.s32.totalorder %v215_v58, 0 }
  0x57   : > { %v512_v27 = vadd.f32 %v496_v0, %v477_v14  ;;  %v495_v28 = vmul.f32 %v1866_v18, %v1640_v26  ;;  %v673_v33 = vadd.f32 %v657_v17, %v638_v20  ;;  %vm247_vm1 = vmand %vm1871_vm13, %vm231_vm14  ;;  %vm359_vm2 = vcmp.eq.s32.totalorder %v215_v58, 1 }
  0x58   : > { %v476_v31 = vadd.f32 %v460_v22, %v441_v15  ;;  %v602_v34 = vmul.f32 %v1847_v6, %v1654_v30  ;;  %v1882_v36 = vsel %vm247_vm1, 1.0, %v1432_v1  ;;  %vm311_vm3 = vmand %vm1871_vm13, %vm295_vm15  ;;  %v621_v37 = vmul.f32 %v1857_v8, %v1660_v32 }
  0x59   : > { %1137 = vmatpush3.msra.mxu0 %v512_v27  ;;  %v656_v38 = vmul.f32 %v1866_v18, %v1668_v35  ;;  %v181_v40 = vshra.s32 %v163_v10, 4  ;;  %1172 = vmatpush3.msra.mxu1 %v673_v33  ;;  %v1892_v44 = vsel %vm311_vm3, 1.0, %v1432_v1  ;;  %vm375_vm4 = vmand %vm1871_vm13, %vm359_vm2  ;;  %v440_v50 = vmul.f32 %v1882_v36, %v1621_v21 }
  0x5a   : > { %1138 = vmatprep.subr.mxu0 %v1432_v1  ;;  %v511_v42 = vadd.f32 %v495_v28, %v476_v31  ;;  %v214_v51 = vsub.s32 %v163_v10, %v1564_v3  ;;  %1173 = vmatprep.subr.mxu1 %v1432_v1  ;;  %v1901_v9 = vsel %vm375_vm4, 1.0, %v1432_v1  ;;  %v459_v53 = vmul.f32 %v1892_v44, %v1634_v25 }
  0x5b   : > { %v637_v54 = vadd.f32 %v621_v37, %v602_v34  ;;  %vm1906_vm5 = vcmp.eq.s32.totalorder %v181_v40, %v1578_v5  ;;  %v494_v57 = vmul.f32 %v1901_v9, %v1640_v26  ;;  %v601_v60 = vmul.f32 %v1882_v36, %v1654_v30 }
  0x5c   : > { %1139 = vmatpush3.msra.mxu0 %v511_v42  ;;  %vm230_vm6 = vcmp.eq.s32.totalorder %v214_v51, 4294967295  ;;  %vm294_vm7 = vcmp.eq.s32.totalorder %v214_v51, 0  ;;  %vm358_vm8 = vcmp.eq.s32.totalorder %v214_v51, 1  ;;  %v475_v58 = vadd.f32 %v459_v53, %v440_v50 }
  0x5d   : > { %1140 = vmatprep.subr.mxu0 %v1432_v1  ;;  %v672_v10 = vadd.f32 %v656_v38, %v637_v54  ;;  %vm246_vm9 = vmand %vm1906_vm5, %vm230_vm6  ;;  %v620_v62 = vmul.f32 %v1892_v44, %v1660_v32  ;;  %v655_v0 = vmul.f32 %v1901_v9, %v1668_v35  ;;  %v162_v7 = vadd.s32 56, %v1562_v2 }
  0x5e   : > { %v1920_v11 = vsel %vm246_vm9, 1.0, %v1432_v1  ;;  %vm310_vm10 = vmand %vm1906_vm5, %vm294_vm7  ;;  %v161_v13 = vadd.s32 48, %v1562_v2  ;;  %v510_v14 = vadd.f32 %v494_v57, %v475_v58  ;;  %v160_v57 = vadd.s32 40, %v1562_v2 }
  0x5f   : > { %1174 = vmatpush3.msra.mxu1 %v672_v10  ;;  %v1929_v15 = vsel %vm310_vm10, 1.0, %v1432_v1  ;;  %vm374_vm11 = vmand %vm1906_vm5, %vm358_vm8  ;;  %v439_v17 = vmul.f32 %v1920_v11, %v1621_v21  ;;  %v636_v22 = vadd.f32 %v620_v62, %v601_v60  ;;  %v180_v27 = vshra.s32 %v162_v7, 4 }
  0x60   : > { %1175 = vmatprep.subr.mxu1 %v1432_v1  ;;  %v1938_v20 = vsel %vm374_vm11, 1.0, %v1432_v1  ;;  %v458_v24 = vmul.f32 %v1929_v15, %v1634_v25  ;;  %v213_v28 = vsub.s32 %v162_v7, %v1564_v3  ;;  %1141 = vmatpush3.msra.mxu0 %v510_v14  ;;  %v600_v34 = vmul.f32 %v1920_v11, %v1654_v30 }
  0x61   : > { %v493_v31 = vmul.f32 %v1938_v20, %v1640_v26  ;;  %v671_v33 = vadd.f32 %v655_v0, %v636_v22  ;;  %v619_v37 = vmul.f32 %v1929_v15, %v1660_v32  ;;  %1142 = vmatprep.subr.mxu0 %v1432_v1  ;;  %vm1951_vm12 = vcmp.eq.s32.totalorder %v180_v27, %v1578_v5 }
  0x62   : > { %v474_v38 = vadd.f32 %v458_v24, %v439_v17  ;;  %vm229_vm13 = vcmp.eq.s32.totalorder %v213_v28, 4294967295  ;;  %vm293_vm14 = vcmp.eq.s32.totalorder %v213_v28, 0  ;;  %vm357_vm1 = vcmp.eq.s32.totalorder %v213_v28, 1 }
  0x63   : > { %1176 = vmatpush3.msra.mxu1 %v671_v33  ;;  %vm245_vm15 = vmand %vm1951_vm12, %vm229_vm13  ;;  %v635_v42 = vadd.f32 %v619_v37, %v600_v34  ;;  %v654_v50 = vmul.f32 %v1938_v20, %v1668_v35  ;;  %v179_v51 = vshra.s32 %v161_v13, 4  ;;  %v212_v55 = vsub.s32 %v161_v13, %v1564_v3 }
  0x64   : > { %v509_v53 = vadd.f32 %v493_v31, %v474_v38  ;;  %1177 = vmatprep.subr.mxu1 %v1432_v1  ;;  %v1961_v54 = vsel %vm245_vm15, 1.0, %v1432_v1  ;;  %vm309_vm2 = vmand %vm1951_vm12, %vm293_vm14  ;;  %v178_v28 = vshra.s32 %v160_v57, 4  ;;  %v211_v37 = vsub.s32 %v160_v57, %v1564_v3 }
  0x65   : > { %v1968_v58 = vsel %vm309_vm2, 1.0, %v1432_v1  ;;  %vm373_vm3 = vmand %vm1951_vm12, %vm357_vm1  ;;  %v438_v10 = vmul.f32 %v1961_v54, %v1621_v21  ;;  %v670_v60 = vadd.f32 %v654_v50, %v635_v42  ;;  %vm1975_vm4 = vcmp.eq.s32.totalorder %v179_v51, %v1578_v5 }
  0x66   : > { %1143 = vmatpush3.msra.mxu0 %v509_v53  ;;  %v1980_v0 = vsel %vm373_vm3, 1.0, %v1432_v1  ;;  %v457_v7 = vmul.f32 %v1968_v58, %v1634_v25  ;;  %vm228_vm5 = vcmp.eq.s32.totalorder %v212_v55, 4294967295  ;;  %vm292_vm6 = vcmp.eq.s32.totalorder %v212_v55, 0 }
  0x67   : > { %1144 = vmatprep.subr.mxu0 %v1432_v1  ;;  %v492_v13 = vmul.f32 %v1980_v0, %v1640_v26  ;;  %1178 = vmatpush3.msra.mxu1 %v670_v60  ;;  %vm244_vm7 = vmand %vm1975_vm4, %vm228_vm5  ;;  %vm356_vm8 = vcmp.eq.s32.totalorder %v212_v55, 1  ;;  %v599_v14 = vmul.f32 %v1961_v54, %v1654_v30  ;;  %v618_v17 = vmul.f32 %v1968_v58, %v1660_v32 }
  0x68   : > { %v473_v22 = vadd.f32 %v457_v7, %v438_v10  ;;  %1179 = vmatprep.subr.mxu1 %v1432_v1  ;;  %v1995_v24 = vsel %vm244_vm7, 1.0, %v1432_v1  ;;  %vm308_vm9 = vmand %vm1975_vm4, %vm292_vm6  ;;  %v653_v27 = vmul.f32 %v1980_v0, %v1668_v35  ;;  %vm2015_vm11 = vcmp.eq.s32.totalorder %v178_v28, %v1578_v5 }
  0x69   : > { %v2002_v31 = vsel %vm308_vm9, 1.0, %v1432_v1  ;;  %vm372_vm10 = vmand %vm1975_vm4, %vm356_vm8  ;;  %v437_v33 = vmul.f32 %v1995_v24, %v1621_v21  ;;  %v634_v34 = vadd.f32 %v618_v17, %v599_v14  ;;  %vm227_vm12 = vcmp.eq.s32.totalorder %v211_v37, 4294967295 }
  0x6a   : > { %v508_v38 = vadd.f32 %v492_v13, %v473_v22  ;;  %v2010_v40 = vsel %vm372_vm10, 1.0, %v1432_v1  ;;  %v456_v42 = vmul.f32 %v2002_v31, %v1634_v25  ;;  %vm291_vm13 = vcmp.eq.s32.totalorder %v211_v37, 0  ;;  %vm243_vm14 = vmand %vm2015_vm11, %vm227_vm12 }
  0x6b   : > { %v491_v51 = vmul.f32 %v2010_v40, %v1640_v26  ;;  %v669_v53 = vadd.f32 %v653_v27, %v634_v34  ;;  %vm355_vm15 = vcmp.eq.s32.totalorder %v211_v37, 1  ;;  %v598_v57 = vmul.f32 %v1995_v24, %v1654_v30  ;;  %vm307_vm1 = vmand %vm2015_vm11, %vm291_vm13 }
  0x6c   : > { %1145 = vmatpush3.msra.mxu0 %v508_v38  ;;  %v472_v55 = vadd.f32 %v456_v42, %v437_v33  ;;  %v617_v10 = vmul.f32 %v2002_v31, %v1660_v32  ;;  %v2029_v60 = vsel %vm243_vm14, 1.0, %v1432_v1  ;;  %v652_v62 = vmul.f32 %v2010_v40, %v1668_v35  ;;  %vm371_vm2 = vmand %vm2015_vm11, %vm355_vm15 }
  0x6d   : > { %1146 = vmatprep.subr.mxu0 %v1432_v1  ;;  %1180 = vmatpush3.msra.mxu1 %v669_v53  ;;  %v159_v7 = vadd.s32 32, %v1562_v2  ;;  %v158_v13 = vadd.s32 24, %v1562_v2  ;;  %v2039_v17 = vsel %vm307_vm1, 1.0, %v1432_v1  ;;  %v436_v22 = vmul.f32 %v2029_v60, %v1621_v21 }
  0x6e   : > { %v507_v14 = vadd.f32 %v491_v51, %v472_v55  ;;  %1181 = vmatprep.subr.mxu1 %v1432_v1  ;;  %v633_v27 = vadd.f32 %v617_v10, %v598_v57  ;;  %v2046_v28 = vsel %vm371_vm2, 1.0, %v1432_v1  ;;  %v455_v33 = vmul.f32 %v2039_v17, %v1634_v25 }
  0x6f   : > { %v177_v34 = vshra.s32 %v159_v7, 4  ;;  %v210_v37 = vsub.s32 %v159_v7, %v1564_v3  ;;  %v490_v38 = vmul.f32 %v2046_v28, %v1640_v26  ;;  %v597_v50 = vmul.f32 %v2029_v60, %v1654_v30 }
  0x70   : > { %1147 = vmatpush3.msra.mxu0 %v507_v14  ;;  %v668_v42 = vadd.f32 %v652_v62, %v633_v27  ;;  %v616_v51 = vmul.f32 %v2039_v17, %v1660_v32  ;;  %v471_v53 = vadd.f32 %v455_v33, %v436_v22  ;;  %v651_v10 = vmul.f32 %v2046_v28, %v1668_v35 }
  0x71   : > { %1148 = vmatprep.subr.mxu0 %v1432_v1  ;;  %vm2059_vm3 = vcmp.eq.s32.totalorder %v177_v34, %v1578_v5  ;;  %vm226_vm4 = vcmp.eq.s32.totalorder %v210_v37, 4294967295  ;;  %vm290_vm5 = vcmp.eq.s32.totalorder %v210_v37, 0  ;;  %vm354_vm7 = vcmp.eq.s32.totalorder %v210_v37, 1 }
  0x72   : > { %1182 = vmatpush3.msra.mxu1 %v668_v42  ;;  %vm242_vm6 = vmand %vm2059_vm3, %vm226_vm4  ;;  %v632_v57 = vadd.f32 %v616_v51, %v597_v50  ;;  %v176_v62 = vshra.s32 %v158_v13, 4  ;;  %v506_v7 = vadd.f32 %v490_v38, %v471_v53  ;;  %v209_v22 = vsub.s32 %v158_v13, %v1564_v3 }
  0x73   : > { %1183 = vmatprep.subr.mxu1 %v1432_v1  ;;  %v2069_v14 = vsel %vm242_vm6, 1.0, %v1432_v1  ;;  %vm306_vm8 = vmand %vm2059_vm3, %vm290_vm5  ;;  %v157_v27 = vadd.s32 16, %v1562_v2 }
  0x74   : > { %v2076_v33 = vsel %vm306_vm8, 1.0, %v1432_v1  ;;  %vm370_vm9 = vmand %vm2059_vm3, %vm354_vm7  ;;  %v435_v34 = vmul.f32 %v2069_v14, %v1621_v21  ;;  %v667_v37 = vadd.f32 %v651_v10, %v632_v57  ;;  %vm2083_vm10 = vcmp.eq.s32.totalorder %v176_v62, %v1578_v5  ;;  %1149 = vmatpush3.msra.mxu0 %v506_v7 }
  0x75   : > { %v2088_v13 = vsel %vm370_vm9, 1.0, %v1432_v1  ;;  %v454_v42 = vmul.f32 %v2076_v33, %v1634_v25  ;;  %vm225_vm11 = vcmp.eq.s32.totalorder %v209_v22, 4294967295  ;;  %vm289_vm12 = vcmp.eq.s32.totalorder %v209_v22, 0  ;;  %1150 = vmatprep.subr.mxu0 %v1432_v1 }
  0x76   : > { %v489_v50 = vmul.f32 %v2088_v13, %v1640_v26  ;;  %1184 = vmatpush3.msra.mxu1 %v667_v37  ;;  %vm241_vm13 = vmand %vm2083_vm10, %vm225_vm11  ;;  %vm353_vm14 = vcmp.eq.s32.totalorder %v209_v22, 1  ;;  %v596_v51 = vmul.f32 %v2069_v14, %v1654_v30  ;;  %v615_v53 = vmul.f32 %v2076_v33, %v1660_v32 }
  0x77   : > { %v470_v55 = vadd.f32 %v454_v42, %v435_v34  ;;  %1185 = vmatprep.subr.mxu1 %v1432_v1  ;;  %v2103_v57 = vsel %vm241_vm13, 1.0, %v1432_v1  ;;  %vm305_vm15 = vmand %vm2083_vm10, %vm289_vm12  ;;  %v650_v10 = vmul.f32 %v2088_v13, %v1668_v35  ;;  %v175_v62 = vshra.s32 %v157_v27, 4 }
  0x78   : > { %v2110_v7 = vsel %vm305_vm15, 1.0, %v1432_v1  ;;  %vm369_vm1 = vmand %vm2083_vm10, %vm353_vm14  ;;  %v434_v22 = vmul.f32 %v2103_v57, %v1621_v21  ;;  %v631_v34 = vadd.f32 %v615_v53, %v596_v51  ;;  %v208_v37 = vsub.s32 %v157_v27, %v1564_v3 }
  0x79   : > { %v505_v42 = vadd.f32 %v489_v50, %v470_v55  ;;  %v2118_v12 = vsel %vm369_vm1, 1.0, %v1432_v1  ;;  %v453_v49 = vmul.f32 %v2110_v7, %v1634_v25  ;;  %vm2123_vm2 = vcmp.eq.s32.totalorder %v175_v62, %v1578_v5 }
  0x7a   : > { %2469 = vst [vmem:[#allocation20_spill] sm:$0xff] %v2118_v12  ;;  %v488_v38 = vmul.f32 %v2118_v12, %v1640_v26  ;;  %v666_v61 = vadd.f32 %v650_v10, %v631_v34  ;;  %vm224_vm3 = vcmp.eq.s32.totalorder %v208_v37, 4294967295  ;;  %vm288_vm4 = vcmp.eq.s32.totalorder %v208_v37, 0 }
  0x7b   : > { %1151 = vmatpush3.msra.mxu0 %v505_v42  ;;  %v469_v27 = vadd.f32 %v453_v49, %v434_v22  ;;  %vm240_vm5 = vmand %vm2123_vm2, %vm224_vm3  ;;  %vm352_vm6 = vcmp.eq.s32.totalorder %v208_v37, 1  ;;  %v595_v50 = vmul.f32 %v2103_v57, %v1654_v30  ;;  %v614_v51 = vmul.f32 %v2110_v7, %v1660_v32 }
  0x7c   : > { %1152 = vmatprep.subr.mxu0 %v1432_v1  ;;  %1186 = vmatpush3.msra.mxu1 %v666_v61  ;;  %v2137_v53 = vsel %vm240_vm5, 1.0, %v1432_v1  ;;  %vm304_vm7 = vmand %vm2123_vm2, %vm288_vm4  ;;  %v649_v49 = vmul.f32 %v2118_v12, %v1668_v35  ;;  %v156_v55 = vadd.s32 8, %v1562_v2  ;;  %v173_v10 = vshra.s32 %v1562_v2, 4 }
  0x7d   : > { %v504_v62 = vadd.f32 %v488_v38, %v469_v27  ;;  %1187 = vmatprep.subr.mxu1 %v1432_v1  ;;  %v2147_v22 = vsel %vm304_vm7, 1.0, %v1432_v1  ;;  %vm368_vm8 = vmand %vm2123_vm2, %vm352_vm6  ;;  %v433_v61 = vmul.f32 %v2137_v53, %v1621_v21  ;;  %v630_v34 = vadd.f32 %v614_v51, %v595_v50 }
  0x7e   : > { %v2154_v37 = vsel %vm368_vm8, 1.0, %v1432_v1  ;;  %v452_v42 = vmul.f32 %v2147_v22, %v1634_v25  ;;  %v174_v46 = vshra.s32 %v156_v55, 4  ;;  %v207_v38 = vsub.s32 %v156_v55, %v1564_v3 }
  0x7f   : > { %1153 = vmatpush3.msra.mxu0 %v504_v62  ;;  %v487_v27 = vmul.f32 %v2154_v37, %v1640_v26  ;;  %v665_v41 = vadd.f32 %v649_v49, %v630_v34  ;;  %v594_v4 = vmul.f32 %v2137_v53, %v1654_v30  ;;  %v613_v50 = vmul.f32 %v2147_v22, %v1660_v32 }
  0x80   : > { %1154 = vmatprep.subr.mxu0 %v1432_v1  ;;  %v468_v51 = vadd.f32 %v452_v42, %v433_v61  ;;  %vm2167_vm9 = vcmp.eq.s32.totalorder %v174_v46, %v1578_v5  ;;  %vm223_vm10 = vcmp.eq.s32.totalorder %v207_v38, 4294967295  ;;  %vm287_vm11 = vcmp.eq.s32.totalorder %v207_v38, 0 }
  0x81   : > { %1188 = vmatpush3.msra.mxu1 %v665_v41  ;;  %vm239_vm12 = vmand %vm2167_vm9, %vm223_vm10  ;;  %vm351_vm13 = vcmp.eq.s32.totalorder %v207_v38, 1  ;;  %v629_v49 = vadd.f32 %v613_v50, %v594_v4  ;;  %v648_v55 = vmul.f32 %v2154_v37, %v1668_v35  ;;  %vm2182_vm15 = vcmp.eq.s32.totalorder %v173_v10, %v1578_v5 }
  0x82   : > { %v503_v62 = vadd.f32 %v487_v27, %v468_v51  ;;  %1189 = vmatprep.subr.mxu1 %v1432_v1  ;;  %v2177_v61 = vsel %vm239_vm12, 1.0, %v1432_v1  ;;  %vm303_vm14 = vmand %vm2167_vm9, %vm287_vm11  ;;  %v206_v46 = vsub.s32 %v1562_v2, %v1564_v3 }
  0x83   : > { %v2189_v34 = vsel %vm303_vm14, 1.0, %v1432_v1  ;;  %vm367_vm1 = vmand %vm2167_vm9, %vm351_vm13  ;;  %v432_v42 = vmul.f32 %v2177_v61, %v1621_v21  ;;  %v664_v38 = vadd.f32 %v648_v55, %v629_v49  ;;  %v593_v27 = vmul.f32 %v2177_v61, %v1654_v30 }
  0x84   : > { %1155 = vmatpush3.msra.mxu0 %v503_v62  ;;  %v2198_v10 = vsel %vm367_vm1, 1.0, %v1432_v1  ;;  %v451_v4 = vmul.f32 %v2189_v34, %v1634_v25  ;;  %vm222_vm2 = vcmp.eq.s32.totalorder %v206_v46, 4294967295  ;;  %vm286_vm3 = vcmp.eq.s32.totalorder %v206_v46, 0 }
  0x85   : > { %1156 = vmatprep.subr.mxu0 %v1432_v1  ;;  %v486_v12 = vmul.f32 %v2198_v10, %v1640_v26  ;;  %1190 = vmatpush3.msra.mxu1 %v664_v38  ;;  %vm238_vm4 = vmand %vm2182_vm15, %vm222_vm2  ;;  %vm350_vm5 = vcmp.eq.s32.totalorder %v206_v46, 1  ;;  %v612_v50 = vmul.f32 %v2189_v34, %v1660_v32  ;;  %v647_v51 = vmul.f32 %v2198_v10, %v1668_v35 }
  0x86   : > { %v467_v49 = vadd.f32 %v451_v4, %v432_v42  ;;  %1191 = vmatprep.subr.mxu1 %v1432_v1  ;;  %v2213_v55 = vsel %vm238_vm4, 1.0, %v1432_v1  ;;  %vm302_vm6 = vmand %vm2182_vm15, %vm286_vm3  ;;  %v808_v62 = vadd.f32 %v1702_v48, %v1690_v45 }
  0x87   : > { %v2220_v46 = vsel %vm302_vm6, 1.0, %v1432_v1  ;;  %vm366_vm7 = vmand %vm2182_vm15, %vm350_vm5  ;;  %v431_v42 = vmul.f32 %v2213_v55, %v1621_v21  ;;  %v628_v38 = vadd.f32 %v612_v50, %v593_v27  ;;  %v592_v4 = vmul.f32 %v2213_v55, %v1654_v30 }
  0x88   : > { %v502_v5 = vadd.f32 %v486_v12, %v467_v49  ;;  %v2229_v2 = vsel %vm366_vm7, 1.0, %v1432_v1  ;;  %v450_v45 = vmul.f32 %v2220_v46, %v1634_v25  ;;  %v611_v48 = vmul.f32 %v2220_v46, %v1660_v32 }
  0x89   : > { %v485_v41 = vmul.f32 %v2229_v2, %v1640_v26  ;;  %v663_v3 = vadd.f32 %v647_v51, %v628_v38  ;;  %v646_v21 = vmul.f32 %v2229_v2, %v1668_v35  ;;  %v2240_v27 = vadd.f32 %v1710_v52, %v808_v62 }
  0x8a   : > { %1157 = vmatpush3.msra.mxu0 %v502_v5  ;;  %v466_v30 = vadd.f32 %v450_v45, %v431_v42  ;;  %v627_v12 = vadd.f32 %v611_v48, %v592_v4  ;;  %v770_v26 = vmul.f32 %v1770_v19, %v1676_v39  ;;  %v789_v50 = vmul.f32 %v1777_v23, %v1687_v43 }
  0x8b   : > { %1158 = vmatprep.subr.mxu0 %v1432_v1  ;;  %1192 = vmatpush3.msra.mxu1 %v663_v3  ;;  %v824_v35 = vmul.f32 %v1787_v29, %v1699_v47  ;;  %v769_v5 = vmul.f32 %v1816_v56, %v1676_v39  ;;  %v788_v3 = vmul.f32 %v1829_v59, %v1687_v43 }
  0x8c   : > { %v501_v25 = vadd.f32 %v485_v41, %v466_v30  ;;  %1193 = vmatprep.subr.mxu1 %v1432_v1  ;;  %v662_v32 = vadd.f32 %v646_v21, %v627_v12  ;;  %v823_v52 = vmul.f32 %v1838_v63, %v1699_v47  ;;  %v805_v19 = vadd.f32 %v789_v50, %v770_v26 }
  0x8d   : > { %v768_v23 = vmul.f32 %v1847_v6, %v1676_v39  ;;  %v804_v29 = vadd.f32 %v788_v3, %v769_v5  ;;  %v787_v56 = vmul.f32 %v1857_v8, %v1687_v43  ;;  %v822_v51 = vmul.f32 %v1866_v18, %v1699_v47 }
  0x8e   : > { %1159 = vmatpush3.msra.mxu0 %v501_v25  ;;  %1194 = vmatpush3.msra.mxu1 %v662_v32  ;;  %v767_v59 = vmul.f32 %v1882_v36, %v1676_v39  ;;  %v2266_v49 = vadd.f32 %v824_v35, %v805_v19  ;;  %v786_v63 = vmul.f32 %v1892_v44, %v1687_v43 }
  0x8f   : > { %1198 = vmatprep.subr.mxu0 %v1432_v1  ;;  %1196 = vmatmul.mubr.f32.vlgmr.msra.gmra.mxu1 %v1608_v16  ;;  %v821_v16 = vmul.f32 %v1901_v9, %v1699_v47  ;;  %v766_v6 = vmul.f32 %v1920_v11, %v1676_v39  ;;  %v2274_v62 = vadd.f32 %v823_v52, %v804_v29 }
  0x90   : > { %v803_v8 = vadd.f32 %v787_v56, %v768_v23  ;;  %v785_v18 = vmul.f32 %v1929_v15, %v1687_v43  ;;  %v820_v36 = vmul.f32 %v1938_v20, %v1699_v47  ;;  %v802_v42 = vadd.f32 %v786_v63, %v767_v59 }
  0x91   : > { %v765_v38 = vmul.f32 %v1961_v54, %v1676_v39  ;;  %v784_v44 = vmul.f32 %v1968_v58, %v1687_v43  ;;  %v819_v9 = vmul.f32 %v1980_v0, %v1699_v47  ;;  %v764_v45 = vmul.f32 %v1995_v24, %v1676_v39 }
  0x92   : > { %v2286_v11 = vadd.f32 %v822_v51, %v803_v8  ;;  %v801_v4 = vadd.f32 %v785_v18, %v766_v6  ;;  %v783_v15 = vmul.f32 %v2002_v31, %v1687_v43  ;;  %v2292_v20 = vadd.f32 %v821_v16, %v802_v42  ;;  %v2479_v6 = vld [vmem:[#allocation17_spill] sm:$0xff]  ;;  %v2480_v8 = vld [vmem:[#allocation18_spill] sm:$0xff] }
  0x93   : > { %v800_v48 = vadd.f32 %v784_v44, %v765_v38  ;;  %v818_v54 = vmul.f32 %v2010_v40, %v1699_v47  ;;  %v763_v58 = vmul.f32 %v2029_v60, %v1676_v39  ;;  %v782_v21 = vmul.f32 %v2039_v17, %v1687_v43  ;;  %v2482_v38 = vld [vmem:[#allocation12_spill] sm:$0xff] }
  0x94   : > { %v2298_v41 = vadd.f32 %v820_v36, %v801_v4  ;;  %v799_v0 = vadd.f32 %v783_v15, %v764_v45  ;;  %v817_v24 = vmul.f32 %v2046_v28, %v1699_v47  ;;  %v762_v31 = vmul.f32 %v2069_v14, %v1676_v39  ;;  %v2476_v28 = vld [vmem:[#allocation20_spill] sm:$0xff]  ;;  %v2483_v45 = vld [vmem:[#allocation19_spill] sm:$0xff] }
  0x95   : > { %v835_v30 = vadd.f32 %v819_v9, %v800_v48  ;;  %v781_v12 = vmul.f32 %v2076_v33, %v1687_v43  ;;  %v816_v40 = vmul.f32 %v2088_v13, %v1699_v47  ;;  %v798_v25 = vadd.f32 %v782_v21, %v763_v58  ;;  %v2485_v21 = vld [vmem:[#allocation13_spill] sm:$0xff] }
  0x96   : > { %v834_v60 = vadd.f32 %v818_v54, %v799_v0  ;;  %v761_v32 = vmul.f32 %v2103_v57, %v1676_v39  ;;  %v780_v17 = vmul.f32 %v2110_v7, %v1687_v43  ;;  %v815_v50 = vmul.f32 %v2476_v28, %v1699_v47 }
  0x97   : > { %v797_v26 = vadd.f32 %v781_v12, %v762_v31  ;;  %v760_v14 = vmul.f32 %v2137_v53, %v1676_v39  ;;  %v779_v33 = vmul.f32 %v2147_v22, %v1687_v43  ;;  %v833_v35 = vadd.f32 %v817_v24, %v798_v25 }
  0x98   : > { %v796_v13 = vadd.f32 %v780_v17, %v761_v32  ;;  %v814_v5 = vmul.f32 %v2154_v37, %v1699_v47  ;;  %v759_v57 = vmul.f32 %v2177_v61, %v1676_v39  ;;  %v778_v52 = vmul.f32 %v2189_v34, %v1687_v43  ;;  %v2477_v34 = vld [vmem:[#allocation14_spill] sm:$0xff] }
  0x99   : > { %v832_v3 = vadd.f32 %v816_v40, %v797_v26  ;;  %v795_v7 = vadd.f32 %v779_v33, %v760_v14  ;;  %v813_v19 = vmul.f32 %v2198_v10, %v1699_v47  ;;  %v758_v22 = vmul.f32 %v2213_v55, %v1676_v39  ;;  %v2478_v10 = vld [vmem:[#allocation15_spill] sm:$0xff] }
  0x9a   : > { %v831_v53 = vadd.f32 %v815_v50, %v796_v13  ;;  %v777_v23 = vmul.f32 %v2220_v46, %v1687_v43  ;;  %v812_v37 = vmul.f32 %v2229_v2, %v1699_v47  ;;  %v794_v61 = vadd.f32 %v778_v52, %v759_v57  ;;  %v2481_v2 = vld [vmem:[#allocation16_spill] sm:$0xff] }
  0x9b   : > { %v830_v29 = vadd.f32 %v814_v5, %v795_v7  ;;  %v772_v63 = vmul.f32 %v2477_v34, %v1676_v39  ;;  %v791_v16 = vmul.f32 %v2478_v10, %v1687_v43  ;;  %v771_v55 = vmul.f32 %v2479_v6, %v1676_v39 }
  0x9c   : > { %v793_v56 = vadd.f32 %v777_v23, %v758_v22  ;;  %v829_v51 = vadd.f32 %v813_v19, %v794_v61  ;;  %v790_v46 = vmul.f32 %v2480_v8, %v1687_v43  ;;  %v826_v36 = vmul.f32 %v2481_v2, %v1699_v47 }
  0x9d   : > { %v807_v18 = vadd.f32 %v791_v16, %v772_v63  ;;  %vm417_vm8 = vcmp.lt.s32.totalorder %v2482_v38, 16  ;;  %v825_v15 = vmul.f32 %v2483_v45, %v1699_v47 }
  0x9e   : > { %v828_v59 = vadd.f32 %v812_v37, %v793_v56  ;;  %v806_v4 = vadd.f32 %v790_v46, %v771_v55 }
  0x9f   : > { %v842_v54 = vadd.f32 %v826_v36, %v807_v18 }
  0xa0   : > { %v841_v39 = vadd.f32 %v825_v15, %v806_v4 }
  0xaf   : > { %v1302_v42 = vpop.permute.xlu0 %1301 }
  0xb0   : > { %v1304_v44 = vunpack.i.h.bf16 %v1302_v42  ;;  %v1303_v9 = vunpack.i.l.bf16 %v1302_v42 }
  0xb2   : > { %v427_v48 = vsel %vm417_vm8, %v1303_v9, %v1304_v44 }
  0xb3   : > { %1161 = vmatmul.mubr.f32.vlgmr.msra.gmra.mxu0 %v427_v48  ;;  %v1307_v43 = vpop.permute.xlu0 %1306 }
  0xb4   : > { %1199 = vmatpush3.msra.mxu0 %v2240_v27  ;;  %1230 = vmatprep.mubr.msk.f32.mxu0 %vm1433_vm0, %v1432_v1  ;;  %v1309_v47 = vunpack.i.h.bf16 %v1307_v43  ;;  %v1308_v27 = vunpack.i.l.bf16 %v1307_v43  ;;  %vm419_vm0 = vcmp.lt.s32.totalorder %v2482_v38, 112 }
  0xb5   : > { %1200 = vmatprep.subr.mxu0 %v1432_v1 }
  0xb6   : > { %1201 = vmatpush3.msra.mxu0 %v842_v54 }
  0xb7   : > { %1202 = vmatprep.subr.mxu0 %v1432_v1 }
  0xb8   : > { %1203 = vmatpush3.msra.mxu0 %v841_v39 }
  0xb9   : > { %1204 = vmatprep.subr.mxu0 %v1432_v1 }
  0xba   : > { %1205 = vmatpush3.msra.mxu0 %v2266_v49  ;;  %v754_v49 = vsel %vm419_vm0, %v1308_v27, %v1309_v47 }
  0xbb   : > { %1206 = vmatprep.subr.mxu0 %v1432_v1 }
  0xbc   : > { %1207 = vmatpush3.msra.mxu0 %v2274_v62 }
  0xbd   : > { %1208 = vmatprep.subr.mxu0 %v1432_v1 }
  0xbe   : > { %1209 = vmatpush3.msra.mxu0 %v2286_v11 }
  0xbf   : > { %1210 = vmatprep.subr.mxu0 %v1432_v1 }
  0xc0   : > { %1211 = vmatpush3.msra.mxu0 %v2292_v20 }
  0xc1   : > { %1212 = vmatprep.subr.mxu0 %v1432_v1 }
  0xc2   : > { %1213 = vmatpush3.msra.mxu0 %v2298_v41  ;;  %v2484_v41 = vld [vmem:[#allocation11_spill] sm:$0xff] }
  0xc3   : > { %1214 = vmatprep.subr.mxu0 %v1432_v1  ;;  %v414_v0 = vmul.u32 8, %v2484_v41 }
  0xc4   : > { %1215 = vmatpush3.msra.mxu0 %v835_v30 }
  0xc5   : > { %1216 = vmatprep.subr.mxu0 %v1432_v1  ;;  %v415_v24 = vadd.s32 %v414_v0, %v2485_v21 }
  0xc6   : > { %1217 = vmatpush3.msra.mxu0 %v834_v60 }
  0xc7   : > { %1218 = vmatprep.subr.mxu0 %v1432_v1  ;;  %v416_v30 = vand.u32 15, %v415_v24 }
  0xc8   : > { %1219 = vmatpush3.msra.mxu0 %v833_v35 }
  0xc9   : > { %1220 = vmatprep.subr.mxu0 %v1432_v1  ;;  %vm418_vm9 = vcmp.ge.s32.totalorder %v416_v30, 1  ;;  %vm420_vm10 = vcmp.lt.s32.totalorder %v416_v30, 15 }
  0xca   : > { %1221 = vmatpush3.msra.mxu0 %v832_v3 }
  0xcb   : > { %1222 = vmatprep.subr.mxu0 %v1432_v1 }
  0xcc   : > { %1223 = vmatpush3.msra.mxu0 %v831_v53 }
  0xcd   : > { %1224 = vmatprep.subr.mxu0 %v1432_v1 }
  0xce   : > { %1225 = vmatpush3.msra.mxu0 %v830_v29 }
  0xcf   : > { %1226 = vmatprep.subr.mxu0 %v1432_v1 }
  0xd0   : > { %1227 = vmatpush3.msra.mxu0 %v829_v51 }
  0xd1   : > { %1228 = vmatprep.subr.mxu0 %v1432_v1 }
  0xd2   : > { %1229 = vmatpush3.msra.mxu0 %v828_v59 }
  0xd3   : > { %1231 = vmatmul.mubr.f32.vlgmr.msra.gmra.mxu0 %v754_v49 }
 0x14f   : > { %v744_v62 = vpop.f32.mrf.mxu1 }
 0x151   : > { %v1197_v11 = vpop.f32.mrf.mxu1 }
 0x173   : > { %v583_v20 = vpop.f32.mrf.mxu0 }
 0x174   : > { %v587_v31 = vsel %vm418_vm9, %v583_v20, 0.0 }
 0x175   : > { %v1162_v58 = vpop.f32.mrf.mxu0  ;;  %v748_v12 = vadd.f32 %v744_v62, %v587_v31 }
 0x193   : > { %v910_v40 = vpop.f32.mrf.mxu0 }
 0x194   : > { %v914_v1 = vsel %vm420_vm10, %v910_v40, 0.0 }
 0x195   : > { %v915_v60 = vadd.f32 %v914_v1, %v748_v12  ;;  %v1232_v25 = vpop.f32.mrf.mxu0 }
 0x197   : > { %vm916_vm11 = vcmp.ne.f32.partialorder %v915_v60, %v915_v60 }
 0x198   : > { %v917_v32 = vsel %vm916_vm11, 1.0, %v915_v60 }
 0x199   : > { %v918_v17 = vmax.f32 %v917_v32, 0.0 }
 0x19b   : > { %v919_v26 = vmin.f32 %v918_v17, 1.0 }
 0x19d   : > { %920 = vst [vmem:[%s153_s30] sm:$0xff] %v919_v26 }
 0x19e   : > { %1359 = shalt.err (!%p1356_p3)
}
 0x19f   : > { %s1360_s20 = scalar_lea.hbm %s934_s6, 128  ;;  %s1364_s0 = scalar_lea.hbm %s2417_s2, 256 }
 0x1a0   : > { %p1361_p5 = scmp.ne.s32.totalorder %s934_s6, %s1360_s20  ;;  %p1365_p10 = scmp.lt.s32.totalorder %s934_s6, %s2417_s2 }
 0x1a1   : > { %p1366_p4 = scmp.lt.s32.totalorder %s1364_s0, %s1360_s20 }
 0x1a2   : > { %p1362_p6 = pnand %p1361_p5, %p1506_p9 }
 0x1a3   : > { %p1367_p13 = por %p1366_p4, %p1365_p10 }
 0x1a4   : > { %p1363_p7 = pneg %p1362_p6 }
 0x1a6   : > { %p1368_p8 = pnand %p1367_p13, %p1363_p7 }
 0x1a8   : > { %1371 = shalt.err (!%p1368_p8)
}
 0x1a9   : > { %1235 = dma.vmem_to_hbm [thread:$0]  (%p1506_p9), %s937_s3, 128, %s934_s6, %s922_s7  }
 0x1aa PF: > { %s948_s28 = sand.u32 1, %s1408_s12   ;;  %p2486_p11 = scmp.ne.s32.totalorder %s2432_s26, 0 }
 0x1ab   : > { %p2487_p12 = scmp.ge.s32.totalorder %s1428_s17, 2  ;;  %s949_s27 = scalar_lea.sflag [#allocation6], %s948_s28 }
 0x1ad   : > { %p1242_p0 = pnand %p2487_p12, %p2486_p11 }
 0x1af   : > { %p1243_p1 = pneg %p1242_p0 }
 0x1b1   : > { %1403 = dma.done.wait (%p1243_p1), %s949_s27, 128  }
 0x1b2   : > { %1405 = vsyncadd (%p1243_p1), %s949_s27, 4294967168  ;;  %s22_s17 = sadd.s32 1, %s1428_s17   ;;  %s2488_s12 = smov %s1412_s13 }
 0x1b3   : > { %p19_p2 = scmp.ge.s32.totalorder %s22_s17, 4   ;;  %s2489_s13 = smov %s1416_s14 }
 0x1b4   : > { %s2490_s14 = smov %s1511_s25  ;;  %s2491_s15 = smov %s1424_s16 }
 0x1b5   : > { %s2492_s16 = smov %s2494_s19  ;;  %21 = sbr.rel (!%p19_p2) target bundleno = 11 (0xb), region = 69 }
 0x1ba   :  { %954 = vsyncpa [#allocation5], 1 }
 0x1bb   :  { %956 = vsyncpa [#allocation5 + $0x1], 1 }
 0x1bc   :  { %957 = vsyncpa [#allocation6], 1 }
 0x1bd   :  { %959 = vsyncpa [#allocation6 + $0x1], 1 }

</bundles_post_ra>
